<compile_context>
chip_gen: v5e
topology: v5e:2x2
jax: 0.10.0
libtpu: 0.0.40
codegen_flags: <defaults>
</compile_context>

<pallas_src>
import functools

import jax
import jax.numpy as jnp
from jax import lax
from jax.experimental import pallas as pl
from jax.experimental.pallas import tpu as pltpu


_VMEM_LIMIT = 48 * 1024 * 1024  # fits v7x's 64 MiB physical VMEM per TC


# ---------------------------------------------------------------------------
# Fused single-pass kernel: one (Bt, C, HW) slab per grid step.
# ---------------------------------------------------------------------------
def _adalin_fused_kernel(x_ref, params_ref, o_ref, *, eps):
    xf = x_ref[...].astype(jnp.float32)                 # (Bt, C, HW)
    bt, c, hw = xf.shape

    # ---- stats: per-channel mean, then centered sum-of-squares (one tile pass
    #      per reduction; cancellation-safe) ------------------------------------
    inst_mean = jnp.sum(xf, axis=2, keepdims=True) * (1.0 / hw)          # (Bt,C,1)
    dx = xf - inst_mean
    inst_m2 = jnp.sum(dx * dx, axis=2, keepdims=True)                    # (Bt,C,1)

    # Layer stats from per-channel partials via exact Chan combination (tiny).
    layer_mean = jnp.sum(inst_mean, axis=1, keepdims=True) * (1.0 / c)   # (Bt,1,1)
    dmean = inst_mean - layer_mean
    layer_m2 = jnp.sum(inst_m2 + hw * (dmean * dmean), axis=1, keepdims=True)

    # ---- tiny per-channel math: rsqrt on stats (EUP slot, ~free) --------------
    inst_inv = lax.rsqrt(inst_m2 * (1.0 / (hw - 1)) + eps)               # unbiased
    layer_inv = lax.rsqrt(layer_m2 * (1.0 / (c * hw - 1)) + eps)

    p = params_ref[...].astype(jnp.float32)                              # (Bt,C,3)
    rho = p[:, :, 0:1]
    gamma = p[:, :, 1:2]
    beta = p[:, :, 2:3]

    w_i = rho * inst_inv                                                 # (Bt,C,1)
    w_l = (1.0 - rho) * layer_inv                                        # (Bt,C,1)
    a = gamma * (w_i + w_l)
    b = beta - gamma * (w_i * inst_mean + w_l * layer_mean)

    # ---- fused apply: one mul + add per element -------------------------------
    o_ref[...] = (xf * a + b).astype(o_ref.dtype)


def _adalin_fused(x, params, *, bt, eps):
    B, C, HW = x.shape
    kernel = functools.partial(_adalin_fused_kernel, eps=eps)
    return pl.pallas_call(
        kernel,
        out_shape=jax.ShapeDtypeStruct((B, C, HW), x.dtype),
        grid_spec=pltpu.PrefetchScalarGridSpec(
            num_scalar_prefetch=0,
            grid=(B // bt,),
            in_specs=[
                pl.BlockSpec((bt, C, HW), lambda i: (i, 0, 0)),
                pl.BlockSpec((bt, C, 3), lambda i: (i, 0, 0)),
            ],
            out_specs=pl.BlockSpec((bt, C, HW), lambda i: (i, 0, 0)),
        ),
        compiler_params=pltpu.CompilerParams(
            dimension_semantics=("parallel",),
            vmem_limit_bytes=_VMEM_LIMIT,
        ),
    )(x, params)


# ---------------------------------------------------------------------------
# Tiled two-pass path for slabs that do not fit comfortably in VMEM.
# ---------------------------------------------------------------------------
def _adalin_stats_kernel(x_ref, mean_ref, m2_ref):
    # One lane-dense (C, thw) tile -> its per-channel mean and centered M2.
    x = x_ref[0].astype(jnp.float32)                                     # (C, thw)
    thw = x.shape[1]
    tile_mean = jnp.sum(x, axis=1, keepdims=True) * (1.0 / thw)          # (C, 1)
    dx = x - tile_mean
    mean_ref[0, 0] = tile_mean
    m2_ref[0, 0] = jnp.sum(dx * dx, axis=1, keepdims=True)


def _adalin_apply_kernel(x_ref, ab_ref, o_ref):
    x = x_ref[0]                                                         # (C, thw)
    ab = ab_ref[0].astype(jnp.float32)                                   # (C, 2)
    a = ab[:, 0:1]
    b = ab[:, 1:2]
    o_ref[0] = (x.astype(jnp.float32) * a + b).astype(o_ref.dtype)


def _pick_hw_tile(hw, max_lanes):
    # Largest 128-multiple divisor of hw that fits the budget (lane-dense,
    # unmasked stores).  Fall back to the full row if none exists.
    # TODO(synk): add remainder masking for HW with no 128-multiple divisor.
    best = 0
    for d in range(128, min(hw, max_lanes) + 1, 128):
        if hw % d == 0:
            best = d
    return best if best > 0 else hw


def _adalin_tiled(x, params, *, eps, max_block_bytes):
    B, C, HW = x.shape
    itemsize = x.dtype.itemsize
    max_lanes = max(128, max_block_bytes // (C * itemsize))
    thw = _pick_hw_tile(HW, max_lanes)
    T = HW // thw

    # Pass 1: per-(batch, tile, channel) mean and centered M2. Fully parallel grid.
    mean_t, m2_t = pl.pallas_call(
        _adalin_stats_kernel,
        out_shape=(
            jax.ShapeDtypeStruct((B, T, C, 1), jnp.float32),
            jax.ShapeDtypeStruct((B, T, C, 1), jnp.float32),
        ),
        grid_spec=pltpu.PrefetchScalarGridSpec(
            num_scalar_prefetch=0,
            grid=(B, T),
            in_specs=[pl.BlockSpec((1, C, thw), lambda b, t: (b, 0, t))],
            out_specs=(
                pl.BlockSpec((1, 1, C, 1), lambda b, t: (b, t, 0, 0)),
                pl.BlockSpec((1, 1, C, 1), lambda b, t: (b, t, 0, 0)),
            ),
        ),
        compiler_params=pltpu.CompilerParams(
            dimension_semantics=("parallel", "parallel"),
            vmem_limit_bytes=_VMEM_LIMIT,
        ),
    )(x)

    # Tiny (B, T, C)/(B, C) host-side combine: exact Chan (parallel-variance)
    # combination across tiles, then across channels; fold into per-channel a,b.
    tile_means = mean_t[..., 0]                                          # (B, T, C)
    tile_m2s = m2_t[..., 0]                                              # (B, T, C)
    inst_mean = jnp.mean(tile_means, axis=1)                             # (B, C)
    d = tile_means - inst_mean[:, None, :]
    inst_m2 = jnp.sum(tile_m2s, axis=1) + thw * jnp.sum(d * d, axis=1)   # (B, C)

    inst_var = inst_m2 / (HW - 1)
    layer_mean = jnp.mean(inst_mean, axis=1, keepdims=True)              # (B, 1)
    dm = inst_mean - layer_mean
    layer_m2 = jnp.sum(inst_m2 + HW * dm * dm, axis=1, keepdims=True)    # (B, 1)
    layer_var = layer_m2 / (C * HW - 1)

    inst_inv = lax.rsqrt(inst_var + eps)                                 # (B, C)
    layer_inv = lax.rsqrt(layer_var + eps)                               # (B, 1)

    rho_ = params[..., 0]
    gamma_ = params[..., 1]
    beta_ = params[..., 2]
    w_i = rho_ * inst_inv
    w_l = (1.0 - rho_) * layer_inv
    a = gamma_ * (w_i + w_l)
    b = beta_ - gamma_ * (w_i * inst_mean + w_l * layer_mean)
    ab = jnp.stack([a, b], axis=-1)                                      # (B, C, 2)

    # Pass 2: lane-dense elementwise apply, 2-D parallel grid (uses both TCs on v7x).
    return pl.pallas_call(
        _adalin_apply_kernel,
        out_shape=jax.ShapeDtypeStruct((B, C, HW), x.dtype),
        grid_spec=pltpu.PrefetchScalarGridSpec(
            num_scalar_prefetch=0,
            grid=(B, T),
            in_specs=[
                pl.BlockSpec((1, C, thw), lambda b, t: (b, 0, t)),
                pl.BlockSpec((1, C, 2), lambda b, t: (b, 0, 0)),
            ],
            out_specs=pl.BlockSpec((1, C, thw), lambda b, t: (b, 0, t)),
        ),
        compiler_params=pltpu.CompilerParams(
            dimension_semantics=("parallel", "parallel"),
            vmem_limit_bytes=_VMEM_LIMIT,
        ),
    )(x, ab)


# ---------------------------------------------------------------------------
# Public wrapper
# ---------------------------------------------------------------------------
def _largest_divisor_leq(n, limit):
    for d in range(min(n, max(1, limit)), 0, -1):
        if n % d == 0:
            return d
    return 1


def adalin(features, gamma, beta, rho, eps=1e-5, max_block_bytes=4 * 1024 * 1024):
    """AdaLIN forward.

    features: (B, C, H, W); gamma, beta: (B, C); rho: (1, C, 1, 1).
    Returns (B, C, H, W).
    """
    B, C, H, W = features.shape
    HW = H * W
    x = features.reshape(B, C, HW)

    # Pack rho/gamma/beta into one lane-contiguous (B, C, 3) side input
    # (one DMA per grid step instead of three width-1 DMAs).
    rho_b = jnp.broadcast_to(rho.reshape(1, C), (B, C)).astype(jnp.float32)
    params = jnp.stack(
        [rho_b, gamma.astype(jnp.float32), beta.astype(jnp.float32)], axis=-1
    )  # (B, C, 3)

    slab_bytes = C * HW * features.dtype.itemsize
    if slab_bytes <= max_block_bytes:
        # Small slab: fuse stats + apply in one pass; block several batch
        # elements together to amortize per-grid-step overhead.
        bt = _largest_divisor_leq(B, max_block_bytes // max(1, slab_bytes))
        out = _adalin_fused(x, params, bt=bt, eps=eps)
    else:
        # Large slab: tiled two-pass (stats kernel + tiny combine + apply kernel).
        out = _adalin_tiled(x, params, eps=eps, max_block_bytes=max_block_bytes)

    return out.reshape(B, C, H, W)


def adalin_ref(features, gamma, beta, rho, eps=1e-5):
    """Pure-JAX reference mirroring the PyTorch forward (unbiased variance)."""
    inst_mean = jnp.mean(features, axis=(2, 3), keepdims=True)
    inst_var = jnp.var(features, axis=(2, 3), keepdims=True, ddof=1)
    inst_norm = (features - inst_mean) / jnp.sqrt(inst_var + eps)
    layer_mean = jnp.mean(features, axis=(1, 2, 3), keepdims=True)
    layer_var = jnp.var(features, axis=(1, 2, 3), keepdims=True, ddof=1)
    layer_norm = (features - layer_mean) / jnp.sqrt(layer_var + eps)
    norm = rho * inst_norm + (1 - rho) * layer_norm
    return norm * gamma[:, :, None, None] + beta[:, :, None, None]


if __name__ == "__main__":
    B, C, H, W = 2, 4, 16, 16
    key = jax.random.PRNGKey(0)
    k1, k2, k3 = jax.random.split(key, 3)

    features = jax.random.normal(k1, (B, C, H, W), dtype=jnp.float32)
    gamma = jax.random.normal(k2, (B, C), dtype=jnp.float32)
    beta = jax.random.normal(k3, (B, C), dtype=jnp.float32)
    # Parameter init like the module: rho filled with 0.9, shape (1, C, 1, 1)
    rho = jnp.full((1, C, 1, 1), 0.9, dtype=jnp.float32)

    ref = adalin_ref(features, gamma, beta, rho)

    # Default (fused single-pass) path.
    out = jax.block_until_ready(adalin(features, gamma, beta, rho))
    assert out.shape == (B, C, H, W)
    assert jnp.allclose(out, ref, atol=1e-4, rtol=1e-4), "fused path mismatch"

    # Force the tiled stats+apply path (large-slab code path) and verify it too.
    out_tiled = jax.block_until_ready(
        adalin(features, gamma, beta, rho, max_block_bytes=2048)
    )
    assert jnp.allclose(out_tiled, ref, atol=1e-4, rtol=1e-4), "tiled path mismatch"

    print("KERNEL_OK")
</pallas_src>

<mosaic_0001>
module attributes {stable_mosaic.version = 11 : i64} {
  func.func @_adalin_fused_kernel(%arg0: i32, %arg1: memref<2x4x256xf32, #tpu.memory_space<vmem>>, %arg2: memref<2x4x3xf32, #tpu.memory_space<vmem>>, %arg3: memref<2x4x256xf32, #tpu.memory_space<vmem>>) attributes {dimension_semantics = [#tpu.dimension_semantics<parallel>], iteration_bounds = array<i64: 1>, scalar_prefetch = 0 : i64, scratch_operands = 0 : i64, tpu.core_type = #tpu.core_type<tc>, window_params = [{transform_indices = @transform_0, window_bounds = array<i64: 2, 4, 256>}, {transform_indices = @transform_1, window_bounds = array<i64: 2, 4, 3>}, {transform_indices = @transform_2, window_bounds = array<i64: 2, 4, 256>}]} {
    %c0 = arith.constant 0 : index
    %c0_0 = arith.constant 0 : index
    %c0_1 = arith.constant 0 : index
    %0 = vector.load %arg1[%c0, %c0_0, %c0_1] : memref<2x4x256xf32, #tpu.memory_space<vmem>>, vector<2x4x256xf32>
    %cst = arith.constant dense<0.000000e+00> : vector<2x4xf32>
    %1 = vector.multi_reduction <add>, %0, %cst [2] : vector<2x4x256xf32> to vector<2x4xf32>
    %2 = vector.shape_cast %1 : vector<2x4xf32> to vector<2x4x1xf32>
    %cst_2 = arith.constant 3.906250e-03 : f32
    %3 = vector.broadcast %cst_2 : f32 to vector<2x4x1xf32>
    %4 = arith.mulf %2, %3 : vector<2x4x1xf32>
    %5 = vector.broadcast %4 : vector<2x4x1xf32> to vector<2x4x256xf32>
    %6 = arith.subf %0, %5 : vector<2x4x256xf32>
    %7 = arith.mulf %6, %6 : vector<2x4x256xf32>
    %cst_3 = arith.constant dense<0.000000e+00> : vector<2x4xf32>
    %8 = vector.multi_reduction <add>, %7, %cst_3 [2] : vector<2x4x256xf32> to vector<2x4xf32>
    %9 = vector.shape_cast %8 : vector<2x4xf32> to vector<2x4x1xf32>
    %cst_4 = arith.constant dense<0.000000e+00> : vector<2x1xf32>
    %10 = vector.multi_reduction <add>, %4, %cst_4 [1] : vector<2x4x1xf32> to vector<2x1xf32>
    %11 = vector.shape_cast %10 : vector<2x1xf32> to vector<2x1x1xf32>
    %cst_5 = arith.constant 2.500000e-01 : f32
    %12 = vector.broadcast %cst_5 : f32 to vector<2x1x1xf32>
    %13 = arith.mulf %11, %12 : vector<2x1x1xf32>
    %14 = vector.broadcast %13 : vector<2x1x1xf32> to vector<2x4x1xf32>
    %15 = arith.subf %4, %14 : vector<2x4x1xf32>
    %16 = arith.mulf %15, %15 : vector<2x4x1xf32>
    %cst_6 = arith.constant 2.560000e+02 : f32
    %17 = vector.broadcast %cst_6 : f32 to vector<2x4x1xf32>
    %18 = arith.mulf %17, %16 : vector<2x4x1xf32>
    %19 = arith.addf %9, %18 : vector<2x4x1xf32>
    %cst_7 = arith.constant dense<0.000000e+00> : vector<2x1xf32>
    %20 = vector.multi_reduction <add>, %19, %cst_7 [1] : vector<2x4x1xf32> to vector<2x1xf32>
    %21 = vector.shape_cast %20 : vector<2x1xf32> to vector<2x1x1xf32>
    %cst_8 = arith.constant 0.00392156886 : f32
    %22 = vector.broadcast %cst_8 : f32 to vector<2x4x1xf32>
    %23 = arith.mulf %9, %22 : vector<2x4x1xf32>
    %cst_9 = arith.constant 9.99999974E-6 : f32
    %24 = vector.broadcast %cst_9 : f32 to vector<2x4x1xf32>
    %25 = arith.addf %23, %24 : vector<2x4x1xf32>
    %26 = math.rsqrt %25 : vector<2x4x1xf32>
    %cst_10 = arith.constant 9.77517105E-4 : f32
    %27 = vector.broadcast %cst_10 : f32 to vector<2x1x1xf32>
    %28 = arith.mulf %21, %27 : vector<2x1x1xf32>
    %cst_11 = arith.constant 9.99999974E-6 : f32
    %29 = vector.broadcast %cst_11 : f32 to vector<2x1x1xf32>
    %30 = arith.addf %28, %29 : vector<2x1x1xf32>
    %31 = math.rsqrt %30 : vector<2x1x1xf32>
    %c0_12 = arith.constant 0 : index
    %c0_13 = arith.constant 0 : index
    %c0_14 = arith.constant 0 : index
    %32 = vector.load %arg2[%c0_12, %c0_13, %c0_14] : memref<2x4x3xf32, #tpu.memory_space<vmem>>, vector<2x4x3xf32>
    %33 = vector.extract_strided_slice %32 {offsets = [0, 0, 0], sizes = [2, 4, 1], strides = [1, 1, 1]} : vector<2x4x3xf32> to vector<2x4x1xf32>
    %34 = vector.extract_strided_slice %32 {offsets = [0, 0, 1], sizes = [2, 4, 1], strides = [1, 1, 1]} : vector<2x4x3xf32> to vector<2x4x1xf32>
    %35 = vector.extract_strided_slice %32 {offsets = [0, 0, 2], sizes = [2, 4, 1], strides = [1, 1, 1]} : vector<2x4x3xf32> to vector<2x4x1xf32>
    %36 = arith.mulf %33, %26 : vector<2x4x1xf32>
    %cst_15 = arith.constant 1.000000e+00 : f32
    %37 = vector.broadcast %cst_15 : f32 to vector<2x4x1xf32>
    %38 = arith.subf %37, %33 : vector<2x4x1xf32>
    %39 = vector.broadcast %31 : vector<2x1x1xf32> to vector<2x4x1xf32>
    %40 = arith.mulf %38, %39 : vector<2x4x1xf32>
    %41 = arith.addf %36, %40 : vector<2x4x1xf32>
    %42 = arith.mulf %34, %41 : vector<2x4x1xf32>
    %43 = arith.mulf %36, %4 : vector<2x4x1xf32>
    %44 = vector.broadcast %13 : vector<2x1x1xf32> to vector<2x4x1xf32>
    %45 = arith.mulf %40, %44 : vector<2x4x1xf32>
    %46 = arith.addf %43, %45 : vector<2x4x1xf32>
    %47 = arith.mulf %34, %46 : vector<2x4x1xf32>
    %48 = arith.subf %35, %47 : vector<2x4x1xf32>
    %49 = vector.broadcast %42 : vector<2x4x1xf32> to vector<2x4x256xf32>
    %50 = arith.mulf %0, %49 : vector<2x4x256xf32>
    %51 = vector.broadcast %48 : vector<2x4x1xf32> to vector<2x4x256xf32>
    %52 = arith.addf %50, %51 : vector<2x4x256xf32>
    %c0_16 = arith.constant 0 : index
    %c0_17 = arith.constant 0 : index
    %c0_18 = arith.constant 0 : index
    %53 = vector.load %arg3[%c0_16, %c0_17, %c0_18] : memref<2x4x256xf32, #tpu.memory_space<vmem>>, vector<2x4x256xf32>
    tpu.vector_store %arg3[%c0_16, %c0_17, %c0_18], %52 {strides = array<i32>} : memref<2x4x256xf32, #tpu.memory_space<vmem>>, vector<2x4x256xf32>,
    return
  }
  func.func @transform_0(%arg0: i32) -> (i32, i32, i32) {
    %c0_i32 = arith.constant 0 : i32
    %c0_i32_0 = arith.constant 0 : i32
    %c0_i32_1 = arith.constant 0 : i32
    return %arg0, %c0_i32, %c0_i32_0 : i32, i32, i32
  }
  func.func @transform_1(%arg0: i32) -> (i32, i32, i32) {
    %c0_i32 = arith.constant 0 : i32
    %c0_i32_0 = arith.constant 0 : i32
    %c0_i32_1 = arith.constant 0 : i32
    return %arg0, %c0_i32, %c0_i32_0 : i32, i32, i32
  }
  func.func @transform_2(%arg0: i32) -> (i32, i32, i32) {
    %c0_i32 = arith.constant 0 : i32
    %c0_i32_0 = arith.constant 0 : i32
    %c0_i32_1 = arith.constant 0 : i32
    return %arg0, %c0_i32, %c0_i32_0 : i32, i32, i32
  }
}

</mosaic_0001>

<bundles_post_ra>
// kernel: tpu_custom_call.1
= control target key start
LH: loop header
LB: loop body
LE: loop exit
PB: predicated region body
PF: predicated region fallthrough
CT: control target
= control target key end

     0   :  { %7 = vsyncpa [#allocation3], 0  ;;  %s458_s0 = inlined_call_operand.hbm [shape: f32[2,4,256], index: 0, kind: input, shape index: {}]   ;;  %s459_s1 = inlined_call_operand.vmem [shape: f32[2,4,3], index: 1, kind: input, shape index: {}]   ;;  %s460_s2 = inlined_call_operand.hbm [shape: f32[2,4,256], index: 2, kind: output, shape index: {}]  }
   0x1   :  { %8 = vsyncpa [#allocation4], 0  ;;  %s13_s11 = sshll.u32 %s458_s0, 4  ;;  %s361_s12 = smov [#allocation2]   ;;  %s14_s11 = int_to_ptr.hbm [resolvable:$true] %s13_s11 }
   0x2   :  { %s15_s13 = sshll.u32 %s361_s12, 4  ;;  %s362_s14 = smov 128   ;;  %s16_s13 = int_to_ptr.vmem [resolvable:$true] %s15_s13 }
   0x3   :  { %s363_s15 = smov 8  }
   0x4   :  { %21 = dma.hbm_to_vmem [thread:$0]  %s14_s11, 256, %s16_s13, [#allocation3], %s362_s14, %s362_s14, %s363_s15  }
   0x5   :  { %357 = dma.done.wait [#allocation3], 256  }
   0x6   :  { %358 = vsyncadd [#allocation3], 4294967040  ;;  %v390_v0 = vld [vmem:[#allocation2] sm:$0xff]  ;;  %v392_v1 = vld [vmem:[#allocation2 + $0x8] sm:$0xff]  ;;  %vm43_vm0 = vcmask 1043456   ;;  %s365_s19 = smov 1  }
   0x7   :  { %32 = vst [vmem:[#allocation1] ss:$2 sm:$0xff] %v390_v0  ;;  %v364_v12 = vmov 839922192   ;;  %s275_s23 = sshll.u32 %s460_s2, 4  ;;  %s276_s23 = int_to_ptr.hbm [resolvable:$true] %s275_s23 }
   0x8   :  { %36 = vst [vmem:[#allocation1 + $0x10] ss:$2 sm:$0xff] %v392_v1  ;;  %v59_v13 = vunpack.c.l.s4 %v364_v12 }
   0xa   :  { %v400_v14 = vunpack.c.0.s8 %v59_v13 }
   0xe   :  { %v33_v2 = vld.sshfl [vmem:[#allocation1] sm:$0xff pattern:$0x75316420]  ;;  %v34_v3 = vld.sshfl [vmem:[#allocation1 + $0x8] sm:$0xff pattern:$0x75316420] }
   0xf   :  { %v44_v4 = vsel %vm43_vm0, %v33_v2, 0.0  ;;  %v45_v5 = vsel %vm43_vm0, %v34_v3, 0.0  ;;  %v37_v7 = vld.sshfl [vmem:[#allocation1 + $0x10] sm:$0xff pattern:$0x75316420] }
  0x10   :  { %v46_v6 = vadd.f32 %v45_v5, %v44_v4  ;;  %v38_v8 = vld.sshfl [vmem:[#allocation1 + $0x18] sm:$0xff pattern:$0x75316420]  ;;  %v49_v9 = vsel %vm43_vm0, %v37_v7, 0.0 }
  0x11   :  { %v50_v10 = vsel %vm43_vm0, %v38_v8, 0.0 }
  0x12   :  { %47 = vadd.xlane.f32.xlu0 %v46_v6  ;;  %v51_v11 = vadd.f32 %v50_v10, %v49_v9 }
  0x1a   :  { %52 = vadd.xlane.f32.xlu0 %v51_v11 }
  0x85   :  { %v48_v15 = vpop.xlane.xlu0 %47 }
  0x86   :  { %v402_v16 = vmul.f32 0.00390625, %v48_v15 }
  0x88   :  { %v61_v17 = vperm.slane %v402_v16, %v400_v14  ;;  %v95_v35 = vsel %vm43_vm0, %v402_v16, 0.0 }
  0x89   :  { %v96_v36 = vrot.slane %v95_v35, 4 }
  0x8a   :  { %v68_v18 = vsub.f32 %v390_v0, %v61_v17 }
  0x8b   :  { %v97_v37 = vadd.f32 %v96_v36, %v95_v35 }
  0x8c   :  { %v70_v19 = vmul.f32 %v68_v18, %v68_v18 }
  0x8d   :  { %v53_v20 = vpop.xlane.xlu0 %52  ;;  %v98_v40 = vrot.slane %v97_v37, 2 }
  0x8e   :  { %74 = vst [vmem:[#allocation1] ss:$2 sm:$0xff] %v70_v19  ;;  %v407_v21 = vmul.f32 0.00390625, %v53_v20 }
  0x8f   :  { %v99_v42 = vadd.f32 %v98_v40, %v97_v37 }
  0x90   :  { %v65_v22 = vperm.slane %v407_v21, %v400_v14  ;;  %v102_v38 = vsel %vm43_vm0, %v407_v21, 0.0 }
  0x91   :  { %v103_v39 = vrot.slane %v102_v38, 4  ;;  %v100_v43 = vrot.slane %v99_v42, 1 }
  0x92   :  { %v69_v23 = vsub.f32 %v392_v1, %v65_v22 }
  0x93   :  { %v104_v41 = vadd.f32 %v103_v39, %v102_v38  ;;  %v101_v45 = vadd.f32 %v100_v43, %v99_v42 }
  0x94   :  { %v71_v24 = vmul.f32 %v69_v23, %v69_v23 }
  0x95   :  { %v75_v25 = vld.sshfl [vmem:[#allocation1] sm:$0xff pattern:$0x75316420]  ;;  %v76_v26 = vld.sshfl [vmem:[#allocation1 + $0x8] sm:$0xff pattern:$0x75316420] }
  0x96   :  { %78 = vst [vmem:[#allocation1 + $0x10] ss:$2 sm:$0xff] %v71_v24  ;;  %v85_v27 = vsel %vm43_vm0, %v75_v25, 0.0  ;;  %v86_v28 = vsel %vm43_vm0, %v76_v26, 0.0  ;;  %v105_v44 = vrot.slane %v104_v41, 2  ;;  %v420_v47 = vmul.f32 0.25, %v101_v45 }
  0x97   :  { %v87_v29 = vadd.f32 %v86_v28, %v85_v27 }
  0x98   :  { %v106_v46 = vadd.f32 %v105_v44, %v104_v41  ;;  %v111_v49 = vsub.f32 %v402_v16, %v420_v47  ;;  %v181_v41 = vld [vmem:[%s459_s1] sm:$0xf] }
  0x99   :  { %88 = vadd.xlane.f32.xlu1 %v87_v29  ;;  %v185_v43 = vsub.f32 1.0, %v181_v41 }
  0x9a   :  { %v107_v48 = vrot.slane %v106_v46, 1  ;;  %v113_v51 = vmul.f32 %v111_v49, %v111_v49 }
  0x9c   :  { %v108_v50 = vadd.f32 %v107_v48, %v106_v46  ;;  %v115_v53 = vmul.f32 256.0, %v113_v51 }
  0x9d   :  { %v79_v30 = vld.sshfl [vmem:[#allocation1 + $0x10] sm:$0xff pattern:$0x75316420]  ;;  %v80_v31 = vld.sshfl [vmem:[#allocation1 + $0x18] sm:$0xff pattern:$0x75316420] }
  0x9e   :  { %v90_v32 = vsel %vm43_vm0, %v79_v30, 0.0  ;;  %v91_v33 = vsel %vm43_vm0, %v80_v31, 0.0  ;;  %v424_v52 = vmul.f32 0.25, %v108_v50 }
  0x9f   :  { %v92_v34 = vadd.f32 %v91_v33, %v90_v32 }
  0xa0   :  { %v112_v54 = vsub.f32 %v407_v21, %v424_v52 }
  0xa1   :  { %93 = vadd.xlane.f32.xlu1 %v92_v34 }
  0xa2   :  { %v114_v60 = vmul.f32 %v112_v54, %v112_v54 }
  0xa4   :  { %v116_v63 = vmul.f32 256.0, %v114_v60  ;;  %v182_v60 = vld [vmem:[%s459_s1 + $0x4] sm:$0xf]  ;;  %s368_s1 = smov [#allocation5]  }
  0xa5   :  { %s273_s20 = sshll.u32 %s368_s1, 4  ;;  %s274_s20 = int_to_ptr.vmem [resolvable:$true] %s273_s20 }
 0x10c   :  { %v89_v55 = vpop.xlane.xlu1 %88 }
 0x10d   :  { %v117_v56 = vadd.f32 %v115_v53, %v89_v55  ;;  %v133_v57 = vmul.f32 0.003921569, %v89_v55 }
 0x10f   :  { %v119_v58 = vsel %vm43_vm0, %v117_v56, 0.0  ;;  %v135_v59 = vadd.f32 1e-05, %v133_v57 }
 0x110   :  { %v120_v61 = vrot.slane %v119_v58, 4 }
 0x111   :  { %301 = vrsqrt.f32 %v135_v59  ;;  %vm143_vm2 = vweird.f32 %v135_v59 }
 0x112   :  { %v121_v62 = vadd.f32 %v120_v61, %v119_v58 }
 0x114   :  { %v122_v2 = vrot.slane %v121_v62, 2  ;;  %v94_v3 = vpop.xlane.xlu1 %93 }
 0x115   :  { %v118_v4 = vadd.f32 %v116_v63, %v94_v3  ;;  %v134_v5 = vmul.f32 0.003921569, %v94_v3 }
 0x116   :  { %v123_v6 = vadd.f32 %v122_v2, %v121_v62  ;;  %v186_v62 = vsub.f32 1.0, %v182_v60 }
 0x117   :  { %v302_v7 = vpop.eup %301  ;;  %v126_v8 = vsel %vm43_vm0, %v118_v4, 0.0  ;;  %v136_v9 = vadd.f32 1e-05, %v134_v5 }
 0x118   :  { %v124_v10 = vrot.slane %v123_v6, 1  ;;  %v127_v11 = vrot.slane %v126_v8, 4  ;;  %v138_v12 = vmul.f32 %v302_v7, %v135_v59  ;;  %vm144_vm1 = vweird.f32 %v302_v7 }
 0x119   :  { %303 = vrsqrt.f32 %v136_v9  ;;  %vm145_vm3 = vmor %vm143_vm2, %vm144_vm1  ;;  %vm153_vm8 = vweird.f32 %v136_v9 }
 0x11a   :  { %v125_v13 = vadd.f32 %v124_v10, %v123_v6  ;;  %v128_v15 = vadd.f32 %v127_v11, %v126_v8  ;;  %v139_v19 = vmul.f32 %v302_v7, %v138_v12 }
 0x11c   :  { %v157_v17 = vmul.f32 0.0009775171, %v125_v13  ;;  %v129_v18 = vrot.slane %v128_v15, 2  ;;  %v140_v25 = vmul.f32 0.5, %v139_v19 }
 0x11e   :  { %v159_v20 = vadd.f32 1e-05, %v157_v17  ;;  %v130_v22 = vadd.f32 %v129_v18, %v128_v15  ;;  %v141_v29 = vsub.f32 1.5, %v140_v25 }
 0x11f   :  { %v304_v23 = vpop.eup %303 }
 0x120   :  { %305 = vrsqrt.f32 %v159_v20  ;;  %v131_v24 = vrot.slane %v130_v22, 1  ;;  %v148_v26 = vmul.f32 %v304_v23, %v136_v9  ;;  %v142_v35 = vmul.f32 %v302_v7, %v141_v29 }
 0x121   :  { %vm167_vm5 = vweird.f32 %v159_v20  ;;  %vm154_vm7 = vweird.f32 %v304_v23 }
 0x122   :  { %v132_v27 = vadd.f32 %v131_v24, %v130_v22  ;;  %v149_v30 = vmul.f32 %v304_v23, %v148_v26  ;;  %v146_v39 = vsel %vm145_vm3, %v302_v7, %v142_v35  ;;  %vm433_vm9 = vmor %vm153_vm8, %vm154_vm7  ;;  %v366_v7 = vmov 1  }
 0x123   :  { %v183_v46 = vmul.f32 %v181_v41, %v146_v39  ;;  %296 = vset.pattern.permute.xlu2 %v366_v7  ;;  %297 = vset.pattern.permute.xlu0 %v366_v7 }
 0x124   :  { %v158_v28 = vmul.f32 0.0009775171, %v132_v27  ;;  %v150_v34 = vmul.f32 0.5, %v149_v30 }
 0x125   :  { %v201_v56 = vmul.f32 %v183_v46, %v402_v16 }
 0x126   :  { %v306_v31 = vpop.eup %305  ;;  %v160_v32 = vadd.f32 1e-05, %v158_v28  ;;  %v151_v38 = vsub.f32 1.5, %v150_v34 }
 0x127   :  { %v162_v33 = vmul.f32 %v306_v31, %v159_v20  ;;  %vm168_vm4 = vweird.f32 %v306_v31 }
 0x128   :  { %307 = vrsqrt.f32 %v160_v32  ;;  %vm169_vm6 = vmor %vm167_vm5, %vm168_vm4  ;;  %v152_v49 = vmul.f32 %v304_v23, %v151_v38  ;;  %vm177_vm11 = vweird.f32 %v160_v32 }
 0x129   :  { %v163_v36 = vmul.f32 %v306_v31, %v162_v33 }
 0x12a   :  { %v156_v58 = vsel %vm433_vm9, %v304_v23, %v152_v49 }
 0x12b   :  { %v164_v37 = vmul.f32 0.5, %v163_v36  ;;  %v184_v16 = vmul.f32 %v182_v60, %v156_v58 }
 0x12d   :  { %v165_v40 = vsub.f32 1.5, %v164_v37  ;;  %v202_v4 = vmul.f32 %v184_v16, %v407_v21  ;;  %v367_v21 = vmov 2  }
 0x12e   :  { %v308_v42 = vpop.eup %307  ;;  %299 = vset.pattern.permute.xlu1 %v367_v21 }
 0x12f   :  { %v172_v44 = vmul.f32 %v308_v42, %v160_v32  ;;  %v166_v45 = vmul.f32 %v306_v31, %v165_v40  ;;  %vm178_vm10 = vweird.f32 %v308_v42 }
 0x130   :  { %vm179_vm12 = vmor %vm177_vm11, %vm178_vm10 }
 0x131   :  { %v170_v48 = vsel %vm169_vm6, %v306_v31, %v166_v45  ;;  %v173_v50 = vmul.f32 %v308_v42, %v172_v44 }
 0x132   :  { %v187_v51 = vmul.f32 %v185_v43, %v170_v48 }
 0x133   :  { %v174_v53 = vmul.f32 0.5, %v173_v50 }
 0x134   :  { %v189_v55 = vadd.f32 %v187_v51, %v183_v46  ;;  %v203_v57 = vmul.f32 %v187_v51, %v420_v47 }
 0x135   :  { %v175_v59 = vsub.f32 1.5, %v174_v53 }
 0x136   :  { %193 = vrot.lane.b32.xlu0 %v189_v55, %s365_s19  ;;  %v205_v61 = vadd.f32 %v203_v57, %v201_v56 }
 0x137   :  { %v176_v63 = vmul.f32 %v308_v42, %v175_v59 }
 0x138   :  { %209 = vrot.lane.b32.xlu2 %v205_v61, %s365_s19 }
 0x139   :  { %v180_v2 = vsel %vm179_vm12, %v308_v42, %v176_v63 }
 0x13a   :  { %v188_v47 = vmul.f32 %v186_v62, %v180_v2 }
 0x13c   :  { %v190_v3 = vadd.f32 %v188_v47, %v184_v16  ;;  %v204_v5 = vmul.f32 %v188_v47, %v424_v52 }
 0x13e   :  { %195 = vrot.lane.b32.xlu1 %v190_v3, %s365_s19  ;;  %v206_v6 = vadd.f32 %v204_v5, %v202_v4 }
 0x140   :  { %211 = vrot.lane.b32.xlu2 %v206_v6, %s365_s19 }
 0x192   :  { %v210_v8 = vpop.permute.xlu2 %209 }
 0x193   :  { %v215_v9 = vmul.f32 %v210_v8, %v181_v41 }
 0x195   :  { %219 = vrot.lane.b32.xlu2 %v215_v9, %s365_s19 }
 0x19a   :  { %v212_v10 = vpop.permute.xlu2 %211 }
 0x19b   :  { %v216_v11 = vmul.f32 %v212_v10, %v182_v60 }
 0x19d   :  { %221 = vrot.lane.b32.xlu2 %v216_v11, %s365_s19 }
 0x1a8   :  { %v194_v12 = vpop.permute.xlu0 %193 }
 0x1a9   :  { %v199_v13 = vmul.f32 %v194_v12, %v181_v41 }
 0x1ab   :  { %229 = vperm.xlu2 %296, %v199_v13  }
 0x1b0   :  { %v196_v15 = vpop.permute.xlu1 %195 }
 0x1b1   :  { %v200_v17 = vmul.f32 %v196_v15, %v182_v60 }
 0x1b3   :  { %233 = vperm.xlu0 %297, %v200_v17   ;;  %298 = vset.pattern.permute.xlu2 %v367_v21 }
 0x1bb   :  { %300 = vset.pattern.permute.xlu0 %v367_v21 }
 0x1ef   :  { %v220_v52 = vpop.permute.xlu2 %219 }
 0x1f0   :  { %v225_v18 = vsub.f32 %v181_v41, %v220_v52 }
 0x1f2   :  { %249 = vperm.xlu2 %298, %v225_v18  }
 0x1f7   :  { %v222_v19 = vpop.permute.xlu2 %221 }
 0x1f8   :  { %v226_v20 = vsub.f32 %v182_v60, %v222_v19 }
 0x1fa   :  { %253 = vperm.xlu1 %299, %v226_v20  }
 0x205   :  { %v230_v22 = vpop.permute.xlu2 %229 }
 0x206   :  { %v238_v23 = vperm.slane %v230_v22, %v400_v14 }
 0x208   :  { %v245_v25 = vmul.f32 %v238_v23, %v390_v0 }
 0x225   :  { %v234_v28 = vpop.permute.xlu0 %233 }
 0x226   :  { %v242_v29 = vperm.slane %v234_v28, %v400_v14 }
 0x228   :  { %v246_v31 = vmul.f32 %v242_v29, %v392_v1 }
 0x24c   :  { %v250_v24 = vpop.permute.xlu2 %249 }
 0x24d   :  { %v258_v26 = vperm.slane %v250_v24, %v400_v14 }
 0x24f   :  { %v265_v27 = vadd.f32 %v258_v26, %v245_v25 }
 0x251   :  { %267 = vst [vmem:[#allocation5] sm:$0xff] %v265_v27 }
 0x26c   :  { %v254_v30 = vpop.permute.xlu1 %253 }
 0x26d   :  { %v262_v32 = vperm.slane %v254_v30, %v400_v14 }
 0x26f   :  { %v266_v33 = vadd.f32 %v262_v32, %v246_v31 }
 0x271   :  { %268 = vst [vmem:[#allocation5 + $0x8] sm:$0xff] %v266_v33 }
 0x272   :  { %281 = dma.vmem_to_hbm [thread:$0]  %s274_s20, 256, %s276_s23, [#allocation4], %s362_s14, %s362_s14, %s363_s15  }
 0x273   :  { %359 = dma.done.wait [#allocation4], 256  }
 0x274   :  { %360 = vsyncadd [#allocation4], 4294967040 }
 0x275   :  { %286 = vsyncpa [#allocation3], 1 }
 0x276   :  { %287 = vsyncpa [#allocation4], 1 }

</bundles_post_ra>
